<compile_context>
chip_gen: v7x
topology: tpu7x:2x2x1
jax: 0.10.0
libtpu: 0.0.40
codegen_flags: <defaults>
</compile_context>

<pallas_src>
import functools

import jax
import jax.numpy as jnp
from jax.experimental import pallas as pl
from jax.experimental.pallas import tpu as pltpu


def _round_up(x, m):
    return (x + m - 1) // m * m


def _soft_attention_kernel(x1_ref, x2_ref, w1_ref, b1_ref, w2_ref, out_ref):
    # x1_ref/x2_ref: [tb, D]  w1_ref: [D, H]  b1_ref: [1, H]  w2_ref: [1, H]
    # out_ref: [tb, D]
    x1 = x1_ref[...]
    x2 = x2_ref[...]
    w1 = w1_ref[...]
    b1 = b1_ref[...]
    w2_row = w2_ref[...]

    # Two MXU matmuls (no [2*tb, D] concat copy); bias + ReLU on the VPU.
    h1 = jnp.maximum(
        jnp.dot(x1, w1, preferred_element_type=jnp.float32) + b1, 0.0)
    h2 = jnp.maximum(
        jnp.dot(x2, w1, preferred_element_type=jnp.float32) + b1, 0.0)

    # Scalar attention score per row: VPU multiply + cross-lane reduce instead
    # of a degenerate [*, H] x [H, 1] MXU matmul.
    s1 = jnp.sum(h1 * w2_row, axis=-1, keepdims=True)   # [tb, 1]
    s2 = jnp.sum(h2 * w2_row, axis=-1, keepdims=True)   # [tb, 1]

    # softmax over the two scores == sigmoid of the score difference (exact
    # normalization, numerically stable; b2 shifts both logits and cancels).
    a1 = 1.0 / (1.0 + jnp.exp(s2 - s1))
    a2 = 1.0 - a1

    out_ref[...] = (a1 * x1 + a2 * x2).astype(out_ref.dtype)


def _num_tensorcores():
    """TensorCores addressable by one pallas_call (megacore / v7x dual-TC)."""
    try:
        dev = jax.devices()[0]
        kind = str(getattr(dev, "device_kind", "")).lower()
        # Single-TC generations first (the 'lite' chips).
        if any(t in kind for t in ("v5e", "v5 lite", "v6e", "v6 lite")):
            return 1
        # Dual-TC generations (megacore v4/v5p, and v7x).
        if any(t in kind for t in ("v4", "v5p", "7x", "v7")):
            return 2
    except Exception:
        pass
    return 1


def _choose_tb(batch, d, h, n_tc):
    """Batch-tile rows: byte-sized blocks, generation-aware grid-step policy."""
    # Per-row VMEM estimate: x1/x2/out double-buffered (6*d*4) + elementwise
    # slack (2*d*4) + the two [tb, H] hidden activations (+ slack).
    bytes_per_row = (8 * d + 4 * h) * 4
    budget = 18 * 1024 * 1024
    vmem_cap = max(8, (budget // bytes_per_row) // 8 * 8)
    b8 = _round_up(batch, 8)

    if n_tc > 1:
        # Dual-TC: aim for >= 2 grid steps per TensorCore so each core keeps
        # its DMA pipeline full, but never shrink tiles below the ~2 MiB
        # HBM-bandwidth sweet spot just to add steps.
        min_rows = _round_up(max(8, (2 * 1024 * 1024) // (d * 4)), 8)
        target = max(min_rows, _round_up(-(-batch // (2 * n_tc)), 8))
    else:
        # Single-TC (v5e / v6e): extra grid steps are pure per-step overhead;
        # take the whole batch in one step when it fits VMEM.
        target = b8

    tb = int(max(8, min(target, b8, vmem_cap)))
    # If the whole batch fits in one block, use exactly B rows (block dim ==
    # full array dim is always legal, even when B is not a multiple of 8).
    if tb >= batch:
        tb = int(batch)
    return tb


@functools.partial(jax.jit, static_argnames=("tb",))
def soft_attention(x1, x2, w1, b1, w2, b2=None, *, tb=None):
    """x1, x2: [B, 1, D] (or [B, D]) float32 -> out: [B, D] float32.

    Weights are stored as [in, out] (transpose of PyTorch Linear's [out, in]).
    b2 is accepted for interface parity but is mathematically irrelevant
    (it cancels in the softmax) and is never loaded by the kernel.
    """
    del b2
    if x1.ndim == 3:
        x1 = jnp.squeeze(x1, axis=1)
        x2 = jnp.squeeze(x2, axis=1)
    B, D = x1.shape
    H = w1.shape[1]

    if tb is None:
        tb = _choose_tb(B, D, H, _num_tensorcores())

    b1_2d = b1.reshape(1, H)
    w2_row = w2.reshape(1, H)   # [H, 1] -> [1, H] row form for the VPU reduce

    grid = (pl.cdiv(B, tb),)
    # Last block dim == full D (legal even if D % 128 != 0); ragged batch is
    # handled by Pallas clipping the final partial block -> no pad / slice.
    batch_spec = pl.BlockSpec((tb, D), lambda i: (i, 0))
    # Constant block index -> block stays resident in VMEM across grid steps.
    resident = lambda shape: pl.BlockSpec(shape, lambda i: (0,) * len(shape))

    out = pl.pallas_call(
        _soft_attention_kernel,
        out_shape=jax.ShapeDtypeStruct((B, D), x1.dtype),
        grid_spec=pl.GridSpec(
            grid=grid,
            in_specs=[
                batch_spec,            # x1 [tb, D]
                batch_spec,            # x2 [tb, D]
                resident((D, H)),      # w1
                resident((1, H)),      # b1
                resident((1, H)),      # w2 (row form)
            ],
            out_specs=batch_spec,
        ),
        compiler_params=pltpu.CompilerParams(
            dimension_semantics=("parallel",),
            vmem_limit_bytes=28 * 1024 * 1024,  # > v5e 16 MiB default, < v7x 64 MiB
        ),
    )(x1, x2, w1, b1_2d, w2_row)

    return out


def _reference(x1, x2, w1, b1, w2, b2):
    x1_2d = jnp.squeeze(x1, axis=1) if x1.ndim == 3 else x1
    x2_2d = jnp.squeeze(x2, axis=1) if x2.ndim == 3 else x2

    def mlp(x):
        h = jnp.maximum(x @ w1 + b1, 0.0)
        return h @ w2 + b2  # [B, 1]  (b2 included here; it cancels in softmax)

    s = jnp.concatenate([mlp(x1_2d), mlp(x2_2d)], axis=1)  # [B, 2]
    w = jax.nn.softmax(s, axis=1)
    return w[:, 0:1] * x1_2d + w[:, 1:2] * x2_2d


if __name__ == "__main__":
    key = jax.random.PRNGKey(0)

    def make_case(k, B, D, H):
        ks = jax.random.split(k, 6)
        x1 = jax.random.normal(ks[0], (B, 1, D), dtype=jnp.float32)
        x2 = jax.random.normal(ks[1], (B, 1, D), dtype=jnp.float32)
        # Parameters stored as [in, out] (transpose of PyTorch Linear weight).
        w1 = jax.random.normal(ks[2], (D, H), dtype=jnp.float32) * 0.05
        b1 = jax.random.normal(ks[3], (H,), dtype=jnp.float32) * 0.05
        w2 = jax.random.normal(ks[4], (H, 1), dtype=jnp.float32) * 0.05
        b2 = jax.random.normal(ks[5], (1,), dtype=jnp.float32) * 0.05
        return x1, x2, w1, b1, w2, b2

    k1, k2 = jax.random.split(key)

    # Case 1: module-native feature sizes (embedding 1023, hidden 128) at a
    # tiny batch; exercises the un-padded 1023-wide lane dim (masked stores).
    args = make_case(k1, 4, 1023, 128)
    out = jax.block_until_ready(soft_attention(*args))
    ref = _reference(*args)
    assert out.shape == (4, 1023)
    assert jnp.allclose(out, ref, atol=3e-3, rtol=3e-3), "case 1 mismatch"

    # Case 2: ragged batch (13 rows, not a multiple of 8) at small dims;
    # exercises the no-pad / no-slice path with block dims == full array dims.
    args = make_case(k2, 13, 256, 32)
    out = jax.block_until_ready(soft_attention(*args))
    ref = _reference(*args)
    assert out.shape == (13, 256)
    assert jnp.allclose(out, ref, atol=3e-3, rtol=3e-3), "case 2 mismatch"

    print("KERNEL_OK")
</pallas_src>

<mosaic_0001>
module attributes {stable_mosaic.version = 11 : i64} {
  func.func @_soft_attention_kernel(%arg0: i32, %arg1: memref<4x1023xf32, #tpu.memory_space<vmem>>, %arg2: memref<4x1023xf32, #tpu.memory_space<vmem>>, %arg3: memref<1023x128xf32, #tpu.memory_space<vmem>>, %arg4: memref<1x128xf32, #tpu.memory_space<vmem>>, %arg5: memref<1x128xf32, #tpu.memory_space<vmem>>, %arg6: memref<4x1023xf32, #tpu.memory_space<vmem>>) attributes {dimension_semantics = [#tpu.dimension_semantics<parallel>], iteration_bounds = array<i64: 1>, scalar_prefetch = 0 : i64, scratch_operands = 0 : i64, tpu.core_type = #tpu.core_type<tc>, window_params = [{transform_indices = @transform_0, window_bounds = array<i64: 4, 1023>}, {transform_indices = @transform_1, window_bounds = array<i64: 4, 1023>}, {pipeline_mode = #tpu.pipeline_mode<synchronous>, transform_indices = @transform_2, window_bounds = array<i64: 1023, 128>}, {pipeline_mode = #tpu.pipeline_mode<synchronous>, transform_indices = @transform_3, window_bounds = array<i64: 1, 128>}, {pipeline_mode = #tpu.pipeline_mode<synchronous>, transform_indices = @transform_4, window_bounds = array<i64: 1, 128>}, {transform_indices = @transform_5, window_bounds = array<i64: 4, 1023>}]} {
    %c0 = arith.constant 0 : index
    %c0_0 = arith.constant 0 : index
    %0 = vector.load %arg1[%c0, %c0_0] : memref<4x1023xf32, #tpu.memory_space<vmem>>, vector<4x1023xf32>
    %c0_1 = arith.constant 0 : index
    %c0_2 = arith.constant 0 : index
    %1 = vector.load %arg2[%c0_1, %c0_2] : memref<4x1023xf32, #tpu.memory_space<vmem>>, vector<4x1023xf32>
    %c0_3 = arith.constant 0 : index
    %c0_4 = arith.constant 0 : index
    %2 = vector.load %arg3[%c0_3, %c0_4] : memref<1023x128xf32, #tpu.memory_space<vmem>>, vector<1023x128xf32>
    %c0_5 = arith.constant 0 : index
    %c0_6 = arith.constant 0 : index
    %3 = vector.load %arg4[%c0_5, %c0_6] : memref<1x128xf32, #tpu.memory_space<vmem>>, vector<1x128xf32>
    %c0_7 = arith.constant 0 : index
    %c0_8 = arith.constant 0 : index
    %4 = vector.load %arg5[%c0_7, %c0_8] : memref<1x128xf32, #tpu.memory_space<vmem>>, vector<1x128xf32>
    %cst = arith.constant dense<0.000000e+00> : vector<4x128xf32>
    %5 = tpu.matmul %0, %2, %cst {dimension_numbers = #tpu.dot_dimension_numbers<[1], [0], [0], [1], [0, 0, 1, 1], [], []>} : vector<4x1023xf32>, vector<1023x128xf32>, vector<4x128xf32> -> vector<4x128xf32>
    %6 = vector.broadcast %3 : vector<1x128xf32> to vector<4x128xf32>
    %7 = arith.addf %5, %6 : vector<4x128xf32>
    %cst_9 = arith.constant 0.000000e+00 : f32
    %8 = vector.broadcast %cst_9 : f32 to vector<4x128xf32>
    %9 = arith.maximumf %7, %8 : vector<4x128xf32>
    %cst_10 = arith.constant dense<0.000000e+00> : vector<4x128xf32>
    %10 = tpu.matmul %1, %2, %cst_10 {dimension_numbers = #tpu.dot_dimension_numbers<[1], [0], [0], [1], [0, 0, 1, 1], [], []>} : vector<4x1023xf32>, vector<1023x128xf32>, vector<4x128xf32> -> vector<4x128xf32>
    %11 = vector.broadcast %3 : vector<1x128xf32> to vector<4x128xf32>
    %12 = arith.addf %10, %11 : vector<4x128xf32>
    %cst_11 = arith.constant 0.000000e+00 : f32
    %13 = vector.broadcast %cst_11 : f32 to vector<4x128xf32>
    %14 = arith.maximumf %12, %13 : vector<4x128xf32>
    %15 = vector.broadcast %4 : vector<1x128xf32> to vector<4x128xf32>
    %16 = arith.mulf %9, %15 : vector<4x128xf32>
    %cst_12 = arith.constant dense<0.000000e+00> : vector<4xf32>
    %17 = vector.multi_reduction <add>, %16, %cst_12 [1] : vector<4x128xf32> to vector<4xf32>
    %18 = vector.shape_cast %17 : vector<4xf32> to vector<4x1xf32>
    %19 = vector.broadcast %4 : vector<1x128xf32> to vector<4x128xf32>
    %20 = arith.mulf %14, %19 : vector<4x128xf32>
    %cst_13 = arith.constant dense<0.000000e+00> : vector<4xf32>
    %21 = vector.multi_reduction <add>, %20, %cst_13 [1] : vector<4x128xf32> to vector<4xf32>
    %22 = vector.shape_cast %21 : vector<4xf32> to vector<4x1xf32>
    %23 = arith.subf %22, %18 : vector<4x1xf32>
    %24 = math.exp %23 : vector<4x1xf32>
    %cst_14 = arith.constant 1.000000e+00 : f32
    %25 = vector.broadcast %cst_14 : f32 to vector<4x1xf32>
    %26 = arith.addf %25, %24 : vector<4x1xf32>
    %cst_15 = arith.constant 1.000000e+00 : f32
    %27 = vector.broadcast %cst_15 : f32 to vector<4x1xf32>
    %28 = arith.divf %27, %26 : vector<4x1xf32>
    %cst_16 = arith.constant 1.000000e+00 : f32
    %29 = vector.broadcast %cst_16 : f32 to vector<4x1xf32>
    %30 = arith.subf %29, %28 : vector<4x1xf32>
    %31 = vector.broadcast %28 : vector<4x1xf32> to vector<4x1023xf32>
    %32 = arith.mulf %31, %0 : vector<4x1023xf32>
    %33 = vector.broadcast %30 : vector<4x1xf32> to vector<4x1023xf32>
    %34 = arith.mulf %33, %1 : vector<4x1023xf32>
    %35 = arith.addf %32, %34 : vector<4x1023xf32>
    %c0_17 = arith.constant 0 : index
    %c0_18 = arith.constant 0 : index
    %36 = vector.load %arg6[%c0_17, %c0_18] : memref<4x1023xf32, #tpu.memory_space<vmem>>, vector<4x1023xf32>
    tpu.vector_store %arg6[%c0_17, %c0_18], %35 {strides = array<i32>} : memref<4x1023xf32, #tpu.memory_space<vmem>>, vector<4x1023xf32>,
    return
  }
  func.func @transform_0(%arg0: i32) -> (i32, i32) {
    %c0_i32 = arith.constant 0 : i32
    %c0_i32_0 = arith.constant 0 : i32
    return %arg0, %c0_i32 : i32, i32
  }
  func.func @transform_1(%arg0: i32) -> (i32, i32) {
    %c0_i32 = arith.constant 0 : i32
    %c0_i32_0 = arith.constant 0 : i32
    return %arg0, %c0_i32 : i32, i32
  }
  func.func @transform_2(%arg0: i32) -> (i32, i32) {
    %c0_i32 = arith.constant 0 : i32
    %c0_i32_0 = arith.constant 0 : i32
    %c0_i32_1 = arith.constant 0 : i32
    return %c0_i32, %c0_i32_0 : i32, i32
  }
  func.func @transform_3(%arg0: i32) -> (i32, i32) {
    %c0_i32 = arith.constant 0 : i32
    %c0_i32_0 = arith.constant 0 : i32
    %c0_i32_1 = arith.constant 0 : i32
    return %c0_i32, %c0_i32_0 : i32, i32
  }
  func.func @transform_4(%arg0: i32) -> (i32, i32) {
    %c0_i32 = arith.constant 0 : i32
    %c0_i32_0 = arith.constant 0 : i32
    %c0_i32_1 = arith.constant 0 : i32
    return %c0_i32, %c0_i32_0 : i32, i32
  }
  func.func @transform_5(%arg0: i32) -> (i32, i32) {
    %c0_i32 = arith.constant 0 : i32
    %c0_i32_0 = arith.constant 0 : i32
    return %arg0, %c0_i32 : i32, i32
  }
}

</mosaic_0001>

<bundles_post_ra>
// kernel: soft_attention.1
= control target key start
LH: loop header
LB: loop body
LE: loop exit
PB: predicated region body
PF: predicated region fallthrough
CT: control target
= control target key end

     0   :  { %10 = vsyncpa [#allocation3], 0  ;;  %s1905_s0 = inlined_call_operand.vmem [shape: f32[4,1023], index: 0, kind: input, shape index: {}]   ;;  %s1906_s1 = inlined_call_operand.vmem [shape: f32[4,1023], index: 1, kind: input, shape index: {}]   ;;  %s1907_s2 = inlined_call_operand.hbm [shape: f32[1023,128], index: 2, kind: input, shape index: {}]   ;;  %s1908_s3 = inlined_call_operand.vmem [shape: f32[1,128], index: 3, kind: input, shape index: {}]   ;;  %s1909_s4 = inlined_call_operand.vmem [shape: f32[1,128], index: 4, kind: input, shape index: {}]   ;;  %s1910_s5 = inlined_call_operand.hbm [shape: f32[4,1023], index: 5, kind: output, shape index: {}]  }
   0x1   :  { %11 = vsyncpa [#allocation4], 0  ;;  %s1466_s18 = smov [#allocation2]   ;;  %s1418_s22 = scalar_lea.hbm %s1907_s2, 16384 }
   0x2   :  { %s21_s19 = sshll.u32 %s1466_s18, 4  ;;  %p1419_p0 = scmp.ne.s32.totalorder %s1907_s2, %s1418_s22  ;;  %s22_s19 = int_to_ptr.vmem [resolvable:$true] %s21_s19 }
   0x3   :  { %p1422_p1 = scmp.lt.u32.totalorder %s1418_s22, %s1907_s2 }
   0x5   :  { %p1424_p2 = pnand %p1422_p1, %p1419_p0 }
   0x7   :  { %1427 = shalt.err (!%p1424_p2)
}
   0x8   :  { %s1428_s27 = scalar_lea.vmem %s22_s19, 16384  ;;  %p1433_p4 = scmp.lt.s32.totalorder %s22_s19, %s22_s19 }
   0x9   :  { %p1429_p3 = scmp.ne.s32.totalorder %s22_s19, %s1428_s27  ;;  %p1434_p5 = scmp.lt.s32.totalorder %s1428_s27, %s1428_s27 }
   0xb   :  { %p1435_p6 = por %p1434_p5, %p1433_p4 }
   0xd   :  { %p1436_p7 = pnand %p1435_p6, %p1429_p3 }
   0xf   :  { %1439 = shalt.err (!%p1436_p7)
}
  0x10   :  { %s1467_s28 = smov 128   ;;  %s1468_s29 = smov 8  }
  0x11   :  { %27 = dma.hbm_to_vmem [thread:$0]  %s1907_s2, 16384, %s22_s19, [#allocation3], %s1467_s28, %s1467_s28, %s1468_s29  }
  0x12   :  { %1462 = dma.done.wait [#allocation3], 16384  }
  0x13   :  { %1463 = vsyncadd [#allocation3], 4294950912  ;;  %v59_v0 = vld [vmem:[#allocation2 + $0x80] sm:$0xff]  ;;  %v60_v1 = vld [vmem:[#allocation2 + $0x88] sm:$0xff]  ;;  %vm190_vm0 = vcmask 1039360   ;;  %vm193_vm1 = vcmask 1046528  }
  0x14   :  { %v43_v2 = vld [vmem:[#allocation2] sm:$0xff]  ;;  %v1513_v3 = vpack.c.bf16 %v60_v1, %v59_v0  ;;  %v44_v4 = vld [vmem:[#allocation2 + $0x8] sm:$0xff]  ;;  %v61_v11 = vld [vmem:[#allocation2 + $0x90] sm:$0xff]  ;;  %vm1469_vm2 = vmmov 1   ;;  %vm779_vm4 = vcmask 1043456   ;;  %vm839_vm5 = vcmask 1039364  }
  0x15   :  { %v91_v5 = vld [vmem:[#allocation2 + $0x180] sm:$0xff]  ;;  %v92_v6 = vld [vmem:[#allocation2 + $0x188] sm:$0xff]  ;;  %v1515_v7 = vpack.c.bf16 %v44_v4, %v43_v2  ;;  %v62_v13 = vld [vmem:[#allocation2 + $0x98] sm:$0xff] }
  0x16   :  { %v1517_v8 = vpack.c.bf16 %v92_v6, %v91_v5  ;;  %v75_v9 = vld [vmem:[#allocation2 + $0x100] sm:$0xff]  ;;  %v76_v10 = vld [vmem:[#allocation2 + $0x108] sm:$0xff]  ;;  %1144 = vmatprep.subr.bf16.mxu0 %v1513_v3  ;;  %v45_v14 = vld [vmem:[#allocation2 + $0x10] sm:$0xff]  ;;  %v1524_v16 = vpack.c.bf16 %v62_v13, %v61_v11 }
  0x17   :  { %v1520_v12 = vpack.c.bf16 %v76_v10, %v75_v9  ;;  %v46_v15 = vld [vmem:[#allocation2 + $0x18] sm:$0xff]  ;;  %1146 = vmatpush3.bf16.msra.mxu0 %v1515_v7  ;;  %v93_v18 = vld [vmem:[#allocation2 + $0x190] sm:$0xff]  ;;  %v63_v23 = vld [vmem:[#allocation2 + $0xa0] sm:$0xff] }
  0x18   :  { %1176 = vmatprep.subr.bf16.mxu1 %v1517_v8  ;;  %v1526_v17 = vpack.c.bf16 %v46_v15, %v45_v14  ;;  %v94_v19 = vld [vmem:[#allocation2 + $0x198] sm:$0xff]  ;;  %v77_v20 = vld [vmem:[#allocation2 + $0x110] sm:$0xff]  ;;  %v64_v24 = vld [vmem:[#allocation2 + $0xa8] sm:$0xff]  ;;  %1148 = vmatprep.subr.bf16.mxu0 %v1524_v16 }
  0x19   :  { %1178 = vmatpush3.bf16.msra.mxu1 %v1520_v12  ;;  %v1529_v21 = vpack.c.bf16 %v94_v19, %v93_v18  ;;  %v78_v22 = vld [vmem:[#allocation2 + $0x118] sm:$0xff]  ;;  %v1534_v26 = vpack.c.bf16 %v64_v24, %v63_v23  ;;  %v47_v27 = vld [vmem:[#allocation2 + $0x20] sm:$0xff]  ;;  %v48_v28 = vld [vmem:[#allocation2 + $0x28] sm:$0xff] }
  0x1a   :  { %v1532_v25 = vpack.c.bf16 %v78_v22, %v77_v20  ;;  %v95_v29 = vld [vmem:[#allocation2 + $0x1a0] sm:$0xff]  ;;  %v96_v30 = vld [vmem:[#allocation2 + $0x1a8] sm:$0xff]  ;;  %v1538_v33 = vpack.c.bf16 %v48_v28, %v47_v27  ;;  %v65_v35 = vld [vmem:[#allocation2 + $0xb0] sm:$0xff] }
  0x1b   :  { %1180 = vmatprep.subr.bf16.mxu1 %v1529_v21  ;;  %v79_v31 = vld [vmem:[#allocation2 + $0x120] sm:$0xff]  ;;  %v80_v32 = vld [vmem:[#allocation2 + $0x128] sm:$0xff]  ;;  %1150 = vmatpush3.bf16.msra.mxu0 %v1526_v17  ;;  %v1540_v34 = vpack.c.bf16 %v96_v30, %v95_v29  ;;  %v66_v36 = vld [vmem:[#allocation2 + $0xb8] sm:$0xff] }
  0x1c   :  { %v49_v37 = vld [vmem:[#allocation2 + $0x30] sm:$0xff]  ;;  %1152 = vmatprep.subr.bf16.mxu0 %v1534_v26  ;;  %v1544_v38 = vpack.c.bf16 %v80_v32, %v79_v31  ;;  %v1546_v39 = vpack.c.bf16 %v66_v36, %v65_v35  ;;  %v50_v40 = vld [vmem:[#allocation2 + $0x38] sm:$0xff]  ;;  %v67_v46 = vld [vmem:[#allocation2 + $0xc0] sm:$0xff] }
  0x1d   :  { %1182 = vmatpush3.bf16.msra.mxu1 %v1532_v25  ;;  %v97_v41 = vld [vmem:[#allocation2 + $0x1b0] sm:$0xff]  ;;  %v98_v42 = vld [vmem:[#allocation2 + $0x1b8] sm:$0xff]  ;;  %v68_v47 = vld [vmem:[#allocation2 + $0xc8] sm:$0xff]  ;;  %v1552_v48 = vpack.c.bf16 %v50_v40, %v49_v37 }
  0x1e   :  { %1184 = vmatprep.subr.bf16.mxu1 %v1540_v34  ;;  %v1549_v43 = vpack.c.bf16 %v98_v42, %v97_v41  ;;  %v81_v44 = vld [vmem:[#allocation2 + $0x130] sm:$0xff]  ;;  %v82_v45 = vld [vmem:[#allocation2 + $0x138] sm:$0xff]  ;;  %v99_v49 = vld [vmem:[#allocation2 + $0x1c0] sm:$0xff]  ;;  %v1558_v52 = vpack.c.bf16 %v68_v47, %v67_v46 }
  0x1f   :  { %1154 = vmatpush3.bf16.msra.mxu0 %v1538_v33  ;;  %v100_v50 = vld [vmem:[#allocation2 + $0x1c8] sm:$0xff]  ;;  %v1556_v51 = vpack.c.bf16 %v82_v45, %v81_v44  ;;  %v51_v53 = vld [vmem:[#allocation2 + $0x40] sm:$0xff]  ;;  %v69_v58 = vld [vmem:[#allocation2 + $0xd0] sm:$0xff] }
  0x20   :  { %1156 = vmatprep.subr.bf16.mxu0 %v1546_v39  ;;  %v52_v54 = vld [vmem:[#allocation2 + $0x48] sm:$0xff]  ;;  %v83_v55 = vld [vmem:[#allocation2 + $0x140] sm:$0xff]  ;;  %v1561_v56 = vpack.c.bf16 %v100_v50, %v99_v49  ;;  %v70_v59 = vld [vmem:[#allocation2 + $0xd8] sm:$0xff] }
  0x21   :  { %1186 = vmatpush3.bf16.msra.mxu1 %v1544_v38  ;;  %v84_v57 = vld [vmem:[#allocation2 + $0x148] sm:$0xff]  ;;  %v101_v60 = vld [vmem:[#allocation2 + $0x1d0] sm:$0xff]  ;;  %v102_v61 = vld [vmem:[#allocation2 + $0x1d8] sm:$0xff]  ;;  %v1564_v62 = vpack.c.bf16 %v52_v54, %v51_v53  ;;  %v1570_v0 = vpack.c.bf16 %v70_v59, %v69_v58 }
  0x22   :  { %1188 = vmatprep.subr.bf16.mxu1 %v1549_v43  ;;  %v1568_v63 = vpack.c.bf16 %v84_v57, %v83_v55  ;;  %v53_v1 = vld [vmem:[#allocation2 + $0x50] sm:$0xff]  ;;  %v54_v2 = vld [vmem:[#allocation2 + $0x58] sm:$0xff]  ;;  %v1573_v5 = vpack.c.bf16 %v102_v61, %v101_v60  ;;  %v71_v9 = vld [vmem:[#allocation2 + $0xe0] sm:$0xff] }
  0x23   :  { %1158 = vmatpush3.bf16.msra.mxu0 %v1552_v48  ;;  %v85_v4 = vld [vmem:[#allocation2 + $0x150] sm:$0xff]  ;;  %v86_v6 = vld [vmem:[#allocation2 + $0x158] sm:$0xff]  ;;  %v72_v10 = vld [vmem:[#allocation2 + $0xe8] sm:$0xff]  ;;  %v1576_v14 = vpack.c.bf16 %v54_v2, %v53_v1 }
  0x24   :  { %1160 = vmatprep.subr.bf16.mxu0 %v1558_v52  ;;  %v103_v11 = vld [vmem:[#allocation2 + $0x1e0] sm:$0xff]  ;;  %v104_v13 = vld [vmem:[#allocation2 + $0x1e8] sm:$0xff]  ;;  %v1580_v19 = vpack.c.bf16 %v86_v6, %v85_v4  ;;  %v1582_v20 = vpack.c.bf16 %v72_v10, %v71_v9  ;;  %v73_v28 = vld [vmem:[#allocation2 + $0xf0] sm:$0xff] }
  0x25   :  { %1190 = vmatpush3.bf16.msra.mxu1 %v1556_v51  ;;  %v55_v15 = vld [vmem:[#allocation2 + $0x60] sm:$0xff]  ;;  %v56_v18 = vld [vmem:[#allocation2 + $0x68] sm:$0xff]  ;;  %v1590_v27 = vpack.c.bf16 %v104_v13, %v103_v11  ;;  %v74_v29 = vld [vmem:[#allocation2 + $0xf8] sm:$0xff] }
  0x26   :  { %1192 = vmatprep.subr.bf16.mxu1 %v1561_v56  ;;  %v87_v22 = vld [vmem:[#allocation2 + $0x160] sm:$0xff]  ;;  %v88_v23 = vld [vmem:[#allocation2 + $0x168] sm:$0xff]  ;;  %v105_v32 = vld [vmem:[#allocation2 + $0x1f0] sm:$0xff]  ;;  %v1606_v37 = vpack.c.bf16 %v56_v18, %v55_v15  ;;  %v1613_v41 = vpack.c.bf16 %v74_v29, %v73_v28 }
  0x27   :  { %1162 = vmatpush3.bf16.msra.mxu0 %v1564_v62  ;;  %v1587_v24 = vld [vmem:[%s1905_s0] sm:$0xff]  ;;  %v1599_v31 = vld [vmem:[%s1905_s0 + $0x8] sm:$0xff]  ;;  %v106_v35 = vld [vmem:[#allocation2 + $0x1f8] sm:$0xff]  ;;  %v1611_v40 = vpack.c.bf16 %v88_v23, %v87_v22 }
  0x28   :  { %1164 = vmatprep.subr.bf16.mxu0 %v1570_v0  ;;  %1929 = vst [vmem:[#allocation8_spill] sm:$0xff] %v1587_v24  ;;  %v1594_v30 = vcombine.high %v1587_v24, %v1587_v24  ;;  %1931 = vst [vmem:[#allocation10_spill] sm:$0xff] %v1599_v31  ;;  %v1603_v36 = vcombine.high %v1599_v31, %v1599_v31  ;;  %v57_v42 = vld [vmem:[#allocation2 + $0x70] sm:$0xff]  ;;  %v58_v44 = vld [vmem:[#allocation2 + $0x78] sm:$0xff]  ;;  %v1616_v46 = vpack.c.bf16 %v106_v35, %v105_v32 }
  0x29   :  { %1194 = vmatpush3.bf16.msra.mxu1 %v1568_v63  ;;  %v89_v45 = vld [vmem:[#allocation2 + $0x170] sm:$0xff]  ;;  %v90_v47 = vld [vmem:[#allocation2 + $0x178] sm:$0xff]  ;;  %v123_v49 = vld [vmem:[#allocation2 + $0x280] sm:$0xff]  ;;  %v1620_v55 = vpack.c.bf16 %v58_v44, %v57_v42 }
  0x2a   :  { %1196 = vmatprep.subr.bf16.mxu1 %v1573_v5  ;;  %1930 = vst [vmem:[#allocation9_spill] sm:$0xff] %v1594_v30  ;;  %1932 = vst [vmem:[#allocation11_spill] sm:$0xff] %v1603_v36  ;;  %261 = vmatprep.mubr.f32.mxu0 %v1594_v30  ;;  %v124_v50 = vld [vmem:[#allocation2 + $0x288] sm:$0xff]  ;;  %v155_v53 = vld [vmem:[#allocation2 + $0x380] sm:$0xff]  ;;  %v1624_v57 = vpack.c.bf16 %v90_v47, %v89_v45 }
  0x2b   :  { %1166 = vmatpush3.bf16.msra.mxu0 %v1576_v14  ;;  %331 = vmatprep.mubr.f32.mxu1 %v1603_v36  ;;  %v156_v54 = vld [vmem:[#allocation2 + $0x388] sm:$0xff]  ;;  %v1626_v58 = vpack.c.bf16 %v124_v50, %v123_v49  ;;  %v107_v59 = vld [vmem:[#allocation2 + $0x200] sm:$0xff]  ;;  %v125_v4 = vld [vmem:[#allocation2 + $0x290] sm:$0xff] }
  0x2c   :  { %1168 = vmatprep.subr.bf16.mxu0 %v1582_v20  ;;  %v108_v60 = vld [vmem:[#allocation2 + $0x208] sm:$0xff]  ;;  %v139_v61 = vld [vmem:[#allocation2 + $0x300] sm:$0xff]  ;;  %v1629_v1 = vpack.c.bf16 %v156_v54, %v155_v53  ;;  %v126_v6 = vld [vmem:[#allocation2 + $0x298] sm:$0xff] }
  0x2d   :  { %1198 = vmatpush3.bf16.msra.mxu1 %v1580_v19  ;;  %v140_v2 = vld [vmem:[#allocation2 + $0x308] sm:$0xff]  ;;  %v157_v9 = vld [vmem:[#allocation2 + $0x390] sm:$0xff]  ;;  %v158_v10 = vld [vmem:[#allocation2 + $0x398] sm:$0xff]  ;;  %v1632_v11 = vpack.c.bf16 %v108_v60, %v107_v59  ;;  %v1638_v15 = vpack.c.bf16 %v126_v6, %v125_v4 }
  0x2e   :  { %1200 = vmatprep.subr.bf16.mxu1 %v1590_v27  ;;  %v1636_v13 = vpack.c.bf16 %v140_v2, %v139_v61  ;;  %v109_v18 = vld [vmem:[#allocation2 + $0x210] sm:$0xff]  ;;  %v110_v22 = vld [vmem:[#allocation2 + $0x218] sm:$0xff]  ;;  %v1641_v28 = vpack.c.bf16 %v158_v10, %v157_v9  ;;  %v127_v32 = vld [vmem:[#allocation2 + $0x2a0] sm:$0xff] }
  0x2f   :  { %1170 = vmatpush3.bf16.msra.mxu0 %v1606_v37  ;;  %v141_v23 = vld [vmem:[#allocation2 + $0x310] sm:$0xff]  ;;  %v142_v29 = vld [vmem:[#allocation2 + $0x318] sm:$0xff]  ;;  %v128_v35 = vld [vmem:[#allocation2 + $0x2a8] sm:$0xff]  ;;  %v1646_v45 = vpack.c.bf16 %v110_v22, %v109_v18 }
  0x30   :  { %1172 = vmatprep.subr.bf16.mxu0 %v1613_v41  ;;  %v159_v42 = vld [vmem:[#allocation2 + $0x3a0] sm:$0xff]  ;;  %v160_v44 = vld [vmem:[#allocation2 + $0x3a8] sm:$0xff]  ;;  %v1650_v47 = vpack.c.bf16 %v142_v29, %v141_v23  ;;  %v1652_v49 = vpack.c.bf16 %v128_v35, %v127_v32  ;;  %v129_v61 = vld [vmem:[#allocation2 + $0x2b0] sm:$0xff] }
  0x31   :  { %1202 = vmatpush3.bf16.msra.mxu1 %v1611_v40  ;;  %v111_v50 = vld [vmem:[#allocation2 + $0x220] sm:$0xff]  ;;  %v112_v53 = vld [vmem:[#allocation2 + $0x228] sm:$0xff]  ;;  %v1655_v59 = vpack.c.bf16 %v160_v44, %v159_v42  ;;  %v130_v2 = vld [vmem:[#allocation2 + $0x2b8] sm:$0xff] }
  0x32   :  { %1204 = vmatprep.subr.bf16.mxu1 %v1616_v46  ;;  %1933 = vst [vmem:[#allocation12_spill] sm:$0xff] %v1652_v49  ;;  %v143_v54 = vld [vmem:[#allocation2 + $0x320] sm:$0xff]  ;;  %v144_v60 = vld [vmem:[#allocation2 + $0x328] sm:$0xff]  ;;  %v161_v4 = vld [vmem:[#allocation2 + $0x3b0] sm:$0xff]  ;;  %v1658_v9 = vpack.c.bf16 %v112_v53, %v111_v50  ;;  %v1664_v22 = vpack.c.bf16 %v130_v2, %v129_v61 }
  0x33   :  { %1174 = vmatpush3.bf16.msra.mxu0 %v1620_v55  ;;  %1934 = vst [vmem:[#allocation13_spill] sm:$0xff] %v1655_v59  ;;  %v162_v6 = vld [vmem:[#allocation2 + $0x3b8] sm:$0xff]  ;;  %v113_v10 = vld [vmem:[#allocation2 + $0x230] sm:$0xff]  ;;  %v1662_v18 = vpack.c.bf16 %v144_v60, %v143_v54  ;;  %v131_v42 = vld [vmem:[#allocation2 + $0x2c0] sm:$0xff] }
  0x34   :  { %1208 = vmatprep.subr.bf16.mxu0 %v1626_v58  ;;  %1935 = vst [vmem:[#allocation14_spill] sm:$0xff] %v1658_v9  ;;  %v114_v23 = vld [vmem:[#allocation2 + $0x238] sm:$0xff]  ;;  %v145_v29 = vld [vmem:[#allocation2 + $0x330] sm:$0xff]  ;;  %v1667_v35 = vpack.c.bf16 %v162_v6, %v161_v4  ;;  %v132_v44 = vld [vmem:[#allocation2 + $0x2c8] sm:$0xff] }
  0x35   :  { %1206 = vmatpush3.bf16.msra.mxu1 %v1624_v57  ;;  %1936 = vst [vmem:[#allocation15_spill] sm:$0xff] %v1662_v18  ;;  %v146_v32 = vld [vmem:[#allocation2 + $0x338] sm:$0xff]  ;;  %v163_v50 = vld [vmem:[#allocation2 + $0x3c0] sm:$0xff]  ;;  %v164_v53 = vld [vmem:[#allocation2 + $0x3c8] sm:$0xff]  ;;  %v1680_v60 = vpack.c.bf16 %v114_v23, %v113_v10  ;;  %v1694_v6 = vpack.c.bf16 %v132_v44, %v131_v42 }
  0x36   :  { %1240 = vmatprep.subr.bf16.mxu1 %v1629_v1  ;;  %262 = vmatmul.mubr.f32.vlgmr.msra.gmra.mrb[0].mxu0 %v1587_v24  ;;  %1937 = vst [vmem:[#allocation16_spill] sm:$0xff] %v1667_v35  ;;  %v1672_v36 = vld [vmem:[%s1905_s0 + $0x10] sm:$0xff]  ;;  %v1677_v54 = vld [vmem:[%s1905_s0 + $0x18] sm:$0xff]  ;;  %v1692_v4 = vpack.c.bf16 %v146_v32, %v145_v29  ;;  %v116_v10 = vld [vmem:[#allocation2 + $0x248] sm:$0xff]  ;;  %v1697_v30 = vpack.c.bf16 %v164_v53, %v163_v50 }
  0x37   :  { %1210 = vmatpush3.bf16.msra.mxu0 %v1632_v11  ;;  %1938 = vst [vmem:[#allocation17_spill] sm:$0xff] %v1680_v60  ;;  %v1684_v61 = vcombine.high %v1672_v36, %v1672_v36  ;;  %v1688_v2 = vcombine.high %v1677_v54, %v1677_v54  ;;  %1942 = vst [vmem:[#allocation21_spill] sm:$0xff] %v1694_v6  ;;  %v147_v23 = vld [vmem:[#allocation2 + $0x340] sm:$0xff]  ;;  %v148_v24 = vld [vmem:[#allocation2 + $0x348] sm:$0xff] }
  0x38   :  { %332 = vmatmul.mubr.f32.vlgmr.msra.gmra.mrb[0].mxu1 %v1599_v31  ;;  %1212 = vmatprep.subr.bf16.mxu0 %v1638_v15  ;;  %1941 = vst [vmem:[#allocation20_spill] sm:$0xff] %v1692_v4  ;;  %v115_v31 = vld [vmem:[#allocation2 + $0x240] sm:$0xff]  ;;  %1943 = vst [vmem:[#allocation22_spill] sm:$0xff] %v1697_v30  ;;  %v1707_v32 = vpack.c.bf16 %v148_v24, %v147_v23  ;;  %v117_v44 = vld [vmem:[#allocation2 + $0x250] sm:$0xff] }
  0x39   :  { %1242 = vmatpush3.bf16.msra.mxu1 %v1636_v13  ;;  %1939 = vst [vmem:[#allocation18_spill] sm:$0xff] %v1684_v61  ;;  %1940 = vst [vmem:[#allocation19_spill] sm:$0xff] %v1688_v2  ;;  %401 = vmatprep.mubr.f32.mxu0 %v1684_v61  ;;  %v1703_v29 = vpack.c.bf16 %v116_v10, %v115_v31  ;;  %v118_v50 = vld [vmem:[#allocation2 + $0x258] sm:$0xff]  ;;  %v149_v53 = vld [vmem:[#allocation2 + $0x350] sm:$0xff] }
  0x3a   :  { %1244 = vmatprep.subr.bf16.mxu1 %v1641_v28  ;;  %859 = vmatprep.mubr.msk.f32.mxu1 %vm190_vm0, %v1688_v2  ;;  %1945 = vst [vmem:[#allocation24_spill] sm:$0xff] %v1707_v32  ;;  %v150_v2 = vld [vmem:[#allocation2 + $0x358] sm:$0xff]  ;;  %v167_v31 = vld [vmem:[#allocation2 + $0x3e0] sm:$0xff]  ;;  %v168_v10 = vld [vmem:[#allocation2 + $0x3e8] sm:$0xff] }
  0x3b   :  { %1214 = vmatpush3.bf16.msra.mxu0 %v1646_v45  ;;  %1944 = vst [vmem:[#allocation23_spill] sm:$0xff] %v1703_v29  ;;  %v1719_v24 = vpack.c.bf16 %v150_v2, %v149_v53  ;;  %v1724_v23 = vpack.c.bf16 %v168_v10, %v167_v31  ;;  %v121_v2 = vld [vmem:[#allocation2 + $0x270] sm:$0xff]  ;;  %v122_v53 = vld [vmem:[#allocation2 + $0x278] sm:$0xff]  ;;  %vm1738_vm3 = vmpackc.low %vm193_vm1, %vm1469_vm2 }
  0x3c   :  { %1216 = vmatprep.subr.bf16.mxu0 %v1652_v49  ;;  %v165_v49 = vld [vmem:[#allocation2 + $0x3d0] sm:$0xff]  ;;  %vm840_vm6 = vmor %vm839_vm5, %vm779_vm4 }
  0x3d   :  { %1246 = vmatpush3.bf16.msra.mxu1 %v1650_v47  ;;  %v153_v10 = vld [vmem:[#allocation2 + $0x370] sm:$0xff] }
  0x3e   :  { %1248 = vmatprep.subr.bf16.mxu1 %v1655_v59  ;;  %v134_v59 = vld [vmem:[#allocation2 + $0x2d8] sm:$0xff] }
  0x3f   :  { %1218 = vmatpush3.bf16.msra.mxu0 %v1658_v9  ;;  %v133_v9 = vld [vmem:[#allocation2 + $0x2d0] sm:$0xff] }
  0x40   :  { %1220 = vmatprep.subr.bf16.mxu0 %v1664_v22  ;;  %v1709_v42 = vpack.c.bf16 %v134_v59, %v133_v9  ;;  %v119_v9 = vld [vmem:[#allocation2 + $0x260] sm:$0xff] }
  0x41   :  { %1250 = vmatpush3.bf16.msra.mxu1 %v1662_v18  ;;  %v166_v18 = vld [vmem:[#allocation2 + $0x3d8] sm:$0xff] }
  0x42   :  { %1252 = vmatprep.subr.bf16.mxu1 %v1667_v35  ;;  %v1712_v61 = vpack.c.bf16 %v166_v18, %v165_v49  ;;  %v135_v35 = vld [vmem:[#allocation2 + $0x2e0] sm:$0xff]  ;;  %v120_v49 = vld [vmem:[#allocation2 + $0x268] sm:$0xff] }
  0x43   :  { %1222 = vmatpush3.bf16.msra.mxu0 %v1680_v60  ;;  %v136_v60 = vld [vmem:[#allocation2 + $0x2e8] sm:$0xff]  ;;  %v151_v18 = vld [vmem:[#allocation2 + $0x360] sm:$0xff] }
  0x44   :  { %1224 = vmatprep.subr.bf16.mxu0 %v1694_v6  ;;  %1946 = vst [vmem:[#allocation25_spill] sm:$0xff] %v1712_v61  ;;  %v1721_v59 = vpack.c.bf16 %v136_v60, %v135_v35  ;;  %v137_v6 = vld [vmem:[#allocation2 + $0x2f0] sm:$0xff] }
  0x45   :  { %1254 = vmatpush3.bf16.msra.mxu1 %v1692_v4  ;;  %v1715_v4 = vpack.c.bf16 %v118_v50, %v117_v44  ;;  %v169_v44 = vld [vmem:[#allocation2 + $0x3f0] sm:$0xff]  ;;  %v170_v50 = vld [vmem:[#allocation2 + $0x3f8] sm:$0x7f] }
  0x46   :  { %1256 = vmatprep.subr.bf16.mxu1 %v1697_v30  ;;  %v152_v30 = vld [vmem:[#allocation2 + $0x368] sm:$0xff]  ;;  %v1736_v31 = vpack.c.bf16 %v170_v50, %v169_v44 }
  0x47   :  { %1226 = vmatpush3.bf16.msra.mxu0 %v1703_v29  ;;  %v138_v29 = vld [vmem:[#allocation2 + $0x2f8] sm:$0xff]  ;;  %v1731_v35 = vpack.c.bf16 %v152_v30, %v151_v18 }
  0x48   :  { %1228 = vmatprep.subr.bf16.mxu0 %v1709_v42  ;;  %v1733_v60 = vpack.c.bf16 %v138_v29, %v137_v6  ;;  %v1755_v6 = vld [vmem:[%s1906_s1] sm:$0xff]  ;;  %v1761_v29 = vld [vmem:[%s1906_s1 + $0x8] sm:$0xff] }
  0x49   :  { %1258 = vmatpush3.bf16.msra.mxu1 %v1707_v32  ;;  %v1727_v32 = vpack.c.bf16 %v120_v49, %v119_v9  ;;  %v1743_v49 = vpack.c.bf16 %v122_v53, %v121_v2  ;;  %v1773_v18 = vcombine.high %v1761_v29, %v1761_v29 }
  0x4a   :  { %1260 = vmatprep.subr.bf16.mxu1 %v1712_v61  ;;  %v154_v61 = vld [vmem:[#allocation2 + $0x378] sm:$0xff] }
  0x4b   :  { %1230 = vmatpush3.bf16.msra.mxu0 %v1715_v4  ;;  %v1747_v30 = vpack.c.bf16 %v154_v61, %v153_v10  ;;  %v1768_v61 = vcombine.high %v1755_v6, %v1755_v6 }
  0x4c   :  { %1232 = vmatprep.subr.bf16.mxu0 %v1721_v59 }
  0x4d   :  { %1262 = vmatpush3.bf16.msra.mxu1 %v1719_v24 }
  0x4e   :  { %1264 = vmatprep.subr.bf16.mxu1 %v1724_v23 }
  0x4f   :  { %1234 = vmatpush3.bf16.msra.mxu0 %v1727_v32 }
  0x50   :  { %1236 = vmatprep.subr.bf16.mxu0 %v1733_v60 }
  0x51   :  { %1266 = vmatpush3.bf16.msra.mxu1 %v1731_v35 }
  0x52   :  { %1269 = vmatprep.subr.msk.bf16.mxu1 %vm1738_vm3, %v1736_v31 }
  0x53   :  { %1238 = vmatpush3.bf16.msra.mxu0 %v1743_v49 }
  0x54   :  { %1273 = vmatprep.subr.bf16.mxu0 %v1513_v3  ;;  %v1809_v3 = vld [vmem:[%s1906_s1 + $0x10] sm:$0xff] }
  0x55   :  { %1271 = vmatpush3.bf16.msra.mxu1 %v1747_v30 }
  0x56   :  { %1305 = vmatprep.subr.bf16.mxu1 %v1517_v8  ;;  %402 = vmatmul.mubr.f32.vlgmr.msra.gmra.mrb[2].mxu0 %v1672_v36  ;;  %v1822_v8 = vcombine.high %v1809_v3, %v1809_v3 }
  0x57   :  { %1275 = vmatpush3.bf16.msra.mxu0 %v1515_v7  ;;  %555 = vmatprep.mubr.f32.mxu0 %v1768_v61  ;;  %v1815_v7 = vld [vmem:[%s1906_s1 + $0x18] sm:$0xff] }
  0x58   :  { %472 = vmatmul.mubr.f32.vlgmr.msra.gmra.mrb[2].mxu1 %v1677_v54  ;;  %1277 = vmatprep.subr.bf16.mxu0 %v1524_v16  ;;  %v1949_v16 = vld [vmem:[#allocation12_spill] sm:$0xff] }
  0x59   :  { %1307 = vmatpush3.bf16.msra.mxu1 %v1520_v12  ;;  %625 = vmatprep.mubr.f32.mxu1 %v1773_v18  ;;  %v1827_v12 = vcombine.high %v1815_v7, %v1815_v7 }
  0x5a   :  { %1309 = vmatprep.subr.bf16.mxu1 %v1529_v21  ;;  %v1951_v21 = vld [vmem:[#allocation14_spill] sm:$0xff] }
  0x5b   :  { %1279 = vmatpush3.bf16.msra.mxu0 %v1526_v17  ;;  %v1950_v17 = vld [vmem:[#allocation13_spill] sm:$0xff] }
  0x5c   :  { %1281 = vmatprep.subr.bf16.mxu0 %v1534_v26  ;;  %v1953_v26 = vld [vmem:[#allocation16_spill] sm:$0xff] }
  0x5d   :  { %1311 = vmatpush3.bf16.msra.mxu1 %v1532_v25  ;;  %v1952_v25 = vld [vmem:[#allocation15_spill] sm:$0xff] }
  0x5e   :  { %1313 = vmatprep.subr.bf16.mxu1 %v1540_v34  ;;  %v1955_v34 = vld [vmem:[#allocation20_spill] sm:$0xff] }
  0x5f   :  { %1283 = vmatpush3.bf16.msra.mxu0 %v1538_v33  ;;  %v1954_v33 = vld [vmem:[#allocation17_spill] sm:$0xff] }
  0x60   :  { %1285 = vmatprep.subr.bf16.mxu0 %v1546_v39  ;;  %v1957_v39 = vld [vmem:[#allocation22_spill] sm:$0xff] }
  0x61   :  { %1315 = vmatpush3.bf16.msra.mxu1 %v1544_v38  ;;  %v1956_v38 = vld [vmem:[#allocation21_spill] sm:$0xff] }
  0x62   :  { %1317 = vmatprep.subr.bf16.mxu1 %v1549_v43  ;;  %v1958_v43 = vld [vmem:[#allocation23_spill] sm:$0xff] }
  0x63   :  { %1287 = vmatpush3.bf16.msra.mxu0 %v1552_v48  ;;  %v1959_v48 = vld [vmem:[#allocation24_spill] sm:$0xff] }
  0x64   :  { %1289 = vmatprep.subr.bf16.mxu0 %v1558_v52 }
  0x65   :  { %1319 = vmatpush3.bf16.msra.mxu1 %v1556_v51  ;;  %v1960_v51 = vld [vmem:[#allocation25_spill] sm:$0xff] }
  0x66   :  { %1321 = vmatprep.subr.bf16.mxu1 %v1561_v56  ;;  %v857_v56 = vld [vmem:[%s1908_s3] ss:$0 sm:$0xff]  ;;  %s1470_s3 = smov [#allocation5]  }
  0x67   :  { %1291 = vmatpush3.bf16.msra.mxu0 %v1564_v62 }
  0x68   :  { %1293 = vmatprep.subr.bf16.mxu0 %v1570_v0 }
  0x69   :  { %1323 = vmatpush3.bf16.msra.mxu1 %v1568_v63 }
  0x6a   :  { %1325 = vmatprep.subr.bf16.mxu1 %v1573_v5 }
  0x6b   :  { %1295 = vmatpush3.bf16.msra.mxu0 %v1576_v14 }
  0x6c   :  { %1297 = vmatprep.subr.bf16.mxu0 %v1582_v20 }
  0x6d   :  { %1327 = vmatpush3.bf16.msra.mxu1 %v1580_v19 }
  0x6e   :  { %1329 = vmatprep.subr.bf16.mxu1 %v1590_v27 }
  0x6f   :  { %1299 = vmatpush3.bf16.msra.mxu0 %v1606_v37 }
  0x70   :  { %1301 = vmatprep.subr.bf16.mxu0 %v1613_v41 }
  0x71   :  { %1331 = vmatpush3.bf16.msra.mxu1 %v1611_v40 }
  0x72   :  { %1333 = vmatprep.subr.bf16.mxu1 %v1616_v46 }
  0x73   :  { %1303 = vmatpush3.bf16.msra.mxu0 %v1620_v55 }
  0x74   :  { %1337 = vmatprep.subr.bf16.mxu0 %v1626_v58 }
  0x75   :  { %1335 = vmatpush3.bf16.msra.mxu1 %v1624_v57 }
  0x76   :  { %1369 = vmatprep.subr.bf16.mxu1 %v1629_v1  ;;  %556 = vmatmul.mubr.f32.vlgmr.msra.gmra.mrb[4].mxu0 %v1755_v6  ;;  %v862_v1 = vld [vmem:[%s1909_s4] ss:$0 sm:$0xff]  ;;  %s848_s4 = sshll.u32 %s1470_s3, 4  ;;  %s849_s4 = int_to_ptr.vmem [resolvable:$true] %s848_s4 }
  0x77   :  { %1339 = vmatpush3.bf16.msra.mxu0 %v1632_v11  ;;  %695 = vmatprep.mubr.f32.mxu0 %v1822_v8  ;;  %s1440_s24 = scalar_lea.vmem %s849_s4, 512  ;;  %p1445_p9 = scmp.lt.s32.totalorder %s849_s4, %s849_s4 }
  0x78   :  { %626 = vmatmul.mubr.f32.vlgmr.msra.gmra.mrb[4].mxu1 %v1761_v29  ;;  %1341 = vmatprep.subr.bf16.mxu0 %v1638_v15  ;;  %p1441_p8 = scmp.ne.s32.totalorder %s849_s4, %s1440_s24  ;;  %p1446_p10 = scmp.lt.s32.totalorder %s1440_s24, %s1440_s24 }
  0x79   :  { %1371 = vmatpush3.bf16.msra.mxu1 %v1636_v13  ;;  %861 = vmatprep.mubr.msk.f32.mxu1 %vm190_vm0, %v1827_v12 }
  0x7a   :  { %1373 = vmatprep.subr.bf16.mxu1 %v1641_v28  ;;  %p1447_p11 = por %p1446_p10, %p1445_p9 }
  0x7b   :  { %1343 = vmatpush3.bf16.msra.mxu0 %v1646_v45 }
  0x7c   :  { %1345 = vmatprep.subr.bf16.mxu0 %v1949_v16  ;;  %p1448_p12 = pnand %p1447_p11, %p1441_p8 }
  0x7d   :  { %1375 = vmatpush3.bf16.msra.mxu1 %v1650_v47 }
  0x7e   :  { %1377 = vmatprep.subr.bf16.mxu1 %v1950_v17 }
  0x7f   :  { %1347 = vmatpush3.bf16.msra.mxu0 %v1951_v21 }
  0x80   :  { %1349 = vmatprep.subr.bf16.mxu0 %v1664_v22 }
  0x81   :  { %1379 = vmatpush3.bf16.msra.mxu1 %v1952_v25 }
  0x82   :  { %1381 = vmatprep.subr.bf16.mxu1 %v1953_v26 }
  0x83   :  { %1351 = vmatpush3.bf16.msra.mxu0 %v1954_v33 }
  0x84   :  { %1353 = vmatprep.subr.bf16.mxu0 %v1956_v38 }
  0x85   :  { %1383 = vmatpush3.bf16.msra.mxu1 %v1955_v34  ;;  %v1961_v34 = vld [vmem:[#allocation8_spill] sm:$0xff] }
  0x86   :  { %1385 = vmatprep.subr.bf16.mxu1 %v1957_v39  ;;  %v1962_v39 = vld [vmem:[#allocation9_spill] sm:$0xff] }
  0x87   :  { %1355 = vmatpush3.bf16.msra.mxu0 %v1958_v43 }
  0x88   :  { %1357 = vmatprep.subr.bf16.mxu0 %v1709_v42 }
  0x89   :  { %1387 = vmatpush3.bf16.msra.mxu1 %v1959_v48  ;;  %v1963_v48 = vld [vmem:[#allocation10_spill] sm:$0xff] }
  0x8a   :  { %1389 = vmatprep.subr.bf16.mxu1 %v1960_v51 }
  0x8b   :  { %1359 = vmatpush3.bf16.msra.mxu0 %v1715_v4 }
  0x8c   :  { %1361 = vmatprep.subr.bf16.mxu0 %v1721_v59 }
  0x8d   :  { %1391 = vmatpush3.bf16.msra.mxu1 %v1719_v24 }
  0x8e   :  { %1393 = vmatprep.subr.bf16.mxu1 %v1724_v23 }
  0x8f   :  { %1363 = vmatpush3.bf16.msra.mxu0 %v1727_v32 }
  0x90   :  { %1365 = vmatprep.subr.bf16.mxu0 %v1733_v60 }
  0x91   :  { %1395 = vmatpush3.bf16.msra.mxu1 %v1731_v35 }
  0x92   :  { %1398 = vmatprep.subr.msk.bf16.mxu1 %vm1738_vm3, %v1736_v31 }
  0x93   :  { %1367 = vmatpush3.bf16.msra.mxu0 %v1743_v49 }
  0x95   :  { %1400 = vmatpush3.bf16.msra.mxu1 %v1747_v30 }
  0x96   :  { %696 = vmatmul.mubr.f32.vlgmr.msra.gmra.mrb[6].mxu0 %v1809_v3 }
  0x98   :  { %766 = vmatmul.mubr.f32.vlgmr.msra.gmra.mrb[6].mxu1 %v1815_v7 }
 0x109   :  { %v895_v52 = vpop.f32.mrb[0].mxu0 }
 0x10a   :  { %v896_v62 = vpop.f32.mrb[1].mxu0 }
 0x10b   :  { %v930_v63 = vpop.f32.mrb[0].mxu1  ;;  %v897_v0 = vadd.f32 %v896_v62, %v895_v52  ;;  %v1964_v52 = vld [vmem:[#allocation11_spill] sm:$0xff] }
 0x10c   :  { %v931_v5 = vpop.f32.mrb[1].mxu1 }
 0x10d   :  { %v932_v14 = vadd.f32 %v931_v5, %v930_v63  ;;  %v264_v19 = vadd.f32 %v897_v0, %v857_v56  ;;  %v1965_v63 = vld [vmem:[#allocation18_spill] sm:$0xff] }
 0x10f   :  { %v334_v20 = vadd.f32 %v932_v14, %v264_v19  ;;  %v1966_v14 = vld [vmem:[#allocation19_spill] sm:$0xff] }
 0x129   :  { %v965_v27 = vpop.f32.mrb[2].mxu0 }
 0x12a   :  { %v966_v37 = vpop.f32.mrb[3].mxu0 }
 0x12b   :  { %v1000_v40 = vpop.f32.mrb[2].mxu1  ;;  %v967_v41 = vadd.f32 %v966_v37, %v965_v27 }
 0x12c   :  { %v1001_v46 = vpop.f32.mrb[3].mxu1 }
 0x12d   :  { %v1002_v55 = vadd.f32 %v1001_v46, %v1000_v40  ;;  %v404_v57 = vadd.f32 %v967_v41, %v334_v20 }
 0x12f   :  { %v474_v58 = vadd.f32 %v1002_v55, %v404_v57 }
 0x131   :  { %v477_v11 = vmax.f32 %v474_v58, 0.0 }
 0x133   :  { %v778_v13 = vmul.f32 %v862_v1, %v477_v11 }
 0x135   :  { %v780_v15 = vsel %vm779_vm4, %v778_v13, 0.0 }
 0x136   :  { %781 = vadd.xlane.f32.xlu0 %v780_v15 }
 0x149   :  { %v1035_v28 = vpop.f32.mrb[4].mxu0 }
 0x14a   :  { %v1036_v45 = vpop.f32.mrb[5].mxu0 }
 0x14b   :  { %v1070_v47 = vpop.f32.mrb[4].mxu1  ;;  %v1037_v22 = vadd.f32 %v1036_v45, %v1035_v28 }
 0x14c   :  { %v1071_v4 = vpop.f32.mrb[5].mxu1 }
 0x14d   :  { %v1072_v32 = vadd.f32 %v1071_v4, %v1070_v47  ;;  %v558_v42 = vadd.f32 %v1037_v22, %v857_v56 }
 0x14f   :  { %v628_v24 = vadd.f32 %v1072_v32, %v558_v42 }
 0x169   :  { %v1105_v59 = vpop.f32.mrb[6].mxu0 }
 0x16a   :  { %v1106_v23 = vpop.f32.mrb[7].mxu0 }
 0x16b   :  { %v1140_v44 = vpop.f32.mrb[6].mxu1  ;;  %v1107_v50 = vadd.f32 %v1106_v23, %v1105_v59 }
 0x16c   :  { %v1141_v35 = vpop.f32.mrb[7].mxu1 }
 0x16d   :  { %v1142_v60 = vadd.f32 %v1141_v35, %v1140_v44  ;;  %v698_v2 = vadd.f32 %v1107_v50, %v628_v24 }
 0x16f   :  { %v768_v53 = vadd.f32 %v1142_v60, %v698_v2 }
 0x171   :  { %v771_v31 = vmax.f32 %v768_v53, 0.0 }
 0x173   :  { %v783_v10 = vmul.f32 %v862_v1, %v771_v31 }
 0x175   :  { %v784_v9 = vsel %vm779_vm4, %v783_v10, 0.0 }
 0x176   :  { %785 = vadd.xlane.f32.xlu0 %v784_v9 }
 0x1c3   :  { %v782_v49 = vpop.xlane.xlu0 %781 }
 0x203   :  { %v786_v30 = vpop.xlane.xlu0 %785 }
 0x204   :  { %v787_v16 = vsub.f32 %v786_v30, %v782_v49 }
 0x206   :  { %v788_v17 = vmul.f32 1.442695, %v787_v16 }
 0x208   :  { %1414 = vpow2.f32 %v788_v17 }
 0x212   :  { %v1415_v21 = vpop.eup %1414 }
 0x213   :  { %v790_v25 = vadd.f32 1.0, %v1415_v21 }
 0x215   :  { %1416 = vrcp.f32 %v790_v25 }
 0x21f   :  { %v1417_v26 = vpop.eup %1416 }
 0x220   :  { %v793_v33 = vsub.f32 1.0, %v1417_v26  ;;  %v795_v38 = vmul.f32 %v1417_v26, %v1961_v34  ;;  %v796_v43 = vmul.f32 %v1417_v26, %v1962_v39  ;;  %v797_v51 = vmul.f32 %v1417_v26, %v1963_v48 }
 0x221   :  { %v798_v56 = vmul.f32 %v1417_v26, %v1964_v52  ;;  %v799_v62 = vmul.f32 %v1417_v26, %v1672_v36  ;;  %v800_v0 = vmul.f32 %v1417_v26, %v1965_v63  ;;  %v801_v5 = vmul.f32 %v1417_v26, %v1677_v54 }
 0x222   :  { %v802_v19 = vmul.f32 %v1417_v26, %v1966_v14  ;;  %v804_v20 = vmul.f32 %v793_v33, %v1755_v6  ;;  %v805_v27 = vmul.f32 %v793_v33, %v1768_v61  ;;  %v806_v37 = vmul.f32 %v793_v33, %v1761_v29 }
 0x223   :  { %v807_v40 = vmul.f32 %v793_v33, %v1773_v18  ;;  %v808_v41 = vmul.f32 %v793_v33, %v1809_v3  ;;  %v809_v46 = vmul.f32 %v793_v33, %v1822_v8  ;;  %v810_v36 = vmul.f32 %v793_v33, %v1815_v7 }
 0x224   :  { %v811_v55 = vmul.f32 %v793_v33, %v1827_v12  ;;  %v812_v57 = vadd.f32 %v804_v20, %v795_v38  ;;  %v813_v54 = vadd.f32 %v805_v27, %v796_v43  ;;  %v814_v58 = vadd.f32 %v806_v37, %v797_v51 }
 0x225   :  { %v815_v1 = vadd.f32 %v807_v40, %v798_v56  ;;  %v816_v11 = vadd.f32 %v808_v41, %v799_v62  ;;  %v817_v6 = vadd.f32 %v809_v46, %v800_v0  ;;  %v818_v13 = vadd.f32 %v810_v36, %v801_v5 }
 0x226   :  { %v819_v29 = vadd.f32 %v811_v55, %v802_v19  ;;  %v828_v61 = vcombine.low %v812_v57, %v813_v54 }
 0x227   :  { %v829_v18 = vcombine.low %v814_v58, %v815_v1  ;;  %v830_v3 = vcombine.low %v816_v11, %v817_v6 }
 0x228   :  { %v831_v8 = vcombine.low %v818_v13, %v819_v29  ;;  %836 = vst [vmem:[#allocation5] sm:$0xff] %v828_v61 }
 0x229   :  { %837 = vst [vmem:[#allocation5 + $0x8] sm:$0xff] %v829_v18  ;;  %838 = vst [vmem:[#allocation5 + $0x10] sm:$0xff] %v830_v3 }
 0x22a   :  { %841 = vst.msk [vmem:[#allocation5 + $0x18] sm:$0xff] %vm840_vm6, %v831_v8 }
 0x22b   :  { %1451 = shalt.err (!%p1448_p12)
}
 0x22c   :  { %s1452_s27 = scalar_lea.hbm %s1910_s5, 512 }
 0x22d   :  { %p1453_p13 = scmp.ne.s32.totalorder %s1910_s5, %s1452_s27  ;;  %p1456_p0 = scmp.lt.u32.totalorder %s1452_s27, %s1910_s5 }
 0x22f   :  { %p1458_p1 = pnand %p1456_p0, %p1453_p13 }
 0x231   :  { %1461 = shalt.err (!%p1458_p1)
}
 0x232   :  { %851 = dma.vmem_to_hbm [thread:$0]  %s849_s4, 512, %s1910_s5, [#allocation4]  }
 0x233   :  { %1464 = dma.done.wait [#allocation4], 512  }
 0x234   :  { %1465 = vsyncadd [#allocation4], 4294966784 }
 0x235   :  { %855 = vsyncpa [#allocation3], 1 }
 0x236   :  { %856 = vsyncpa [#allocation4], 1 }

</bundles_post_ra>
